<compile_context>
chip_gen: v7x
topology: tpu7x:2x2x1
jax: 0.10.0
libtpu: 0.0.40
codegen_flags: <defaults>
</compile_context>

<pallas_src>
import functools

import jax
import jax.numpy as jnp
from jax.experimental import pallas as pl
from jax.experimental.pallas import tpu as pltpu


def _round_up(x: int, m: int) -> int:
    return ((x + m - 1) // m) * m


def critic_kernel(s_ref, a_ref, w1s_ref, w1a_ref, b1_ref, w2_ref, b2_ref,
                  w3_ref, b3_ref, o_ref):
    # Layer 1: fused concat -> two matmuls into the same f32 accumulator (MXU).
    # Activations cast to bf16 only as MXU operands; accumulation stays f32.
    s_bf = s_ref[...].astype(jnp.bfloat16)                       # (TB, D_s)
    a_bf = a_ref[...].astype(jnp.bfloat16)                       # (TB, D_a)
    h1 = jnp.dot(s_bf, w1s_ref[...], preferred_element_type=jnp.float32)
    h1 = h1 + jnp.dot(a_bf, w1a_ref[...], preferred_element_type=jnp.float32)
    h1 = jnp.maximum(h1 + b1_ref[...], 0.0)                      # f32 bias + ReLU (VPU)

    # Layer 2: (TB,256)@(256,256), bf16 operands, f32 accumulation.
    h2 = jnp.dot(h1.astype(jnp.bfloat16), w2_ref[...],
                 preferred_element_type=jnp.float32)
    h2 = jnp.maximum(h2 + b2_ref[...], 0.0)                      # f32 bias + ReLU

    # Layer 3: N=1 output -> VPU multiply + lane reduction instead of a
    # lane-sparse MXU matmul. w3_ref is the (1, 256) f32 weight row.
    q = jnp.sum(h2 * w3_ref[...], axis=-1, keepdims=True) + b3_ref[...]
    o_ref[...] = q.astype(o_ref.dtype)                           # (TB, 1)


def prepare_kernel_params(params, input_dim):
    """One-time conversion of f32 PyTorch-style params to kernel layout.

    Splits w1 along the (state|action) feature axis, casts matmul weights to
    bf16, and lays w3 out as a (1, 256) f32 row for the VPU reduction.
    Do this once (outside the per-step forward) so no per-call cast ops run.
    """
    w1, b1, w2, b2, w3, b3 = params
    w1_s = w1[:input_dim, :].astype(jnp.bfloat16)        # (D_s, FC1)
    w1_a = w1[input_dim:, :].astype(jnp.bfloat16)        # (D_a, FC1)
    w2_bf = w2.astype(jnp.bfloat16)                      # (FC1, FC2)
    w3_row = jnp.reshape(w3, (1, -1)).astype(jnp.float32)  # (1, FC2)
    b3_2d = jnp.reshape(b3, (1, 1)).astype(jnp.float32)    # (1, 1)
    return (w1_s, w1_a, b1.astype(jnp.float32), w2_bf, b2.astype(jnp.float32),
            w3_row, b3_2d)


@functools.partial(jax.jit, static_argnames=())
def critic_forward(state, action, kernel_params):
    """state: (B, D_s) f32, action: (B, D_a) f32 -> q-value: (B, 1) f32."""
    w1_s, w1_a, b1, w2, b2, w3_row, b3 = kernel_params
    B, d_s = state.shape
    d_a = action.shape[1]
    fc1 = w1_s.shape[1]
    fc2 = w2.shape[1]

    # Batch tile: one tile for small B (rounded to the 8-sublane quantum),
    # 128-row tiles with a parallel grid for training-size batches.
    if B <= 128:
        tb = max(_round_up(B, 8), 8)
    else:
        tb = 128
    bp = _round_up(B, tb)
    if bp != B:
        pad = bp - B
        state = jnp.pad(state, ((0, pad), (0, 0)))
        action = jnp.pad(action, ((0, pad), (0, 0)))
    grid = (bp // tb,)

    # Weights/biases: full-array blocks with constant index_map -> loaded once,
    # VMEM-resident across all batch tiles.
    const2d = lambda i: (0, 0)
    in_specs = [
        pl.BlockSpec((tb, d_s), lambda i: (i, 0)),   # state  (batch-blocked)
        pl.BlockSpec((tb, d_a), lambda i: (i, 0)),   # action (batch-blocked)
        pl.BlockSpec((d_s, fc1), const2d),           # w1_s  bf16
        pl.BlockSpec((d_a, fc1), const2d),           # w1_a  bf16
        pl.BlockSpec((1, fc1), const2d),             # b1    f32
        pl.BlockSpec((fc1, fc2), const2d),           # w2    bf16
        pl.BlockSpec((1, fc2), const2d),             # b2    f32
        pl.BlockSpec((1, fc2), const2d),             # w3row f32
        pl.BlockSpec((1, 1), const2d),               # b3    f32
    ]
    out_spec = pl.BlockSpec((tb, 1), lambda i: (i, 0))

    param_bytes = sum(int(p.size) * p.dtype.itemsize
                      for p in (w1_s, w1_a, b1, w2, b2, w3_row, b3))
    cost = pl.CostEstimate(
        flops=2 * bp * ((d_s + d_a) * fc1 + fc1 * fc2 + fc2),
        transcendentals=0,
        bytes_accessed=int(state.nbytes + action.nbytes + param_bytes + bp * 4),
    )

    out = pl.pallas_call(
        critic_kernel,
        out_shape=jax.ShapeDtypeStruct((bp, 1), jnp.float32),
        grid=grid,
        in_specs=in_specs,
        out_specs=out_spec,
        compiler_params=pltpu.CompilerParams(
            dimension_semantics=("parallel",)),      # v7x: split batch tiles across TCs
        cost_estimate=cost,
    )(state, action, w1_s, w1_a, b1, w2, b2, w3_row, b3)

    return out[:B]
    # TODO(synk): for SAC training, fuse both twin critics (Q1, Q2) into one
    # pallas_call to amortize launch + weight-DMA cost further.


def init_params(key, input_dim, n_actions, fc1_dims=256, fc2_dims=256):
    """Deterministic synthetic init (PyTorch-Linear-like uniform fan-in scaling).

    Returns f32 params in the PyTorch-equivalent layout:
      w: (in_features, out_features), b: (1, out_features).
    """
    d_in = input_dim + n_actions
    ks = jax.random.split(key, 6)

    def lin(kw, kb, fan_in, fan_out):
        bound = 1.0 / jnp.sqrt(jnp.float32(fan_in))
        w = jax.random.uniform(kw, (fan_in, fan_out), jnp.float32, -bound, bound)
        b = jax.random.uniform(kb, (1, fan_out), jnp.float32, -bound, bound)
        return w, b

    w1, b1 = lin(ks[0], ks[1], d_in, fc1_dims)
    w2, b2 = lin(ks[2], ks[3], fc1_dims, fc2_dims)
    w3, b3 = lin(ks[4], ks[5], fc2_dims, 1)
    return (w1, b1, w2, b2, w3, b3)


if __name__ == "__main__":
    key = jax.random.PRNGKey(0)
    k_state, k_action, k_params = jax.random.split(key, 3)

    B = 8              # batch
    INPUT_DIM = 16     # input_dims[0]
    N_ACTIONS = 4      # n_actions
    FC1, FC2 = 256, 256

    state = jax.random.normal(k_state, (B, INPUT_DIM), jnp.float32)
    action = jax.random.normal(k_action, (B, N_ACTIONS), jnp.float32)
    params = init_params(k_params, INPUT_DIM, N_ACTIONS, FC1, FC2)
    kparams = prepare_kernel_params(params, INPUT_DIM)   # one-time bf16 split/cast

    q = critic_forward(state, action, kparams)
    jax.block_until_ready(q)
    assert q.shape == (B, 1)

    # --- Reference 1: precision-matched (bf16 matmul weights, f32 accumulation,
    #     VPU-style final reduction) -> should agree tightly with the kernel.
    w1_s, w1_a, b1, w2_bf, b2, w3_row, b3 = kparams
    h1 = jnp.maximum(
        jnp.dot(state.astype(jnp.bfloat16), w1_s, preferred_element_type=jnp.float32)
        + jnp.dot(action.astype(jnp.bfloat16), w1_a, preferred_element_type=jnp.float32)
        + b1, 0.0)
    h2 = jnp.maximum(
        jnp.dot(h1.astype(jnp.bfloat16), w2_bf, preferred_element_type=jnp.float32)
        + b2, 0.0)
    q_ref_bf16 = jnp.sum(h2 * w3_row, axis=-1, keepdims=True) + b3
    assert jnp.allclose(q, q_ref_bf16, atol=1e-3, rtol=1e-3)

    # --- Reference 2: full-f32 PyTorch-equivalent forward (loose tolerance for
    #     the bf16 weight storage).
    w1, b1f, w2, b2f, w3, b3f = params
    x = jnp.concatenate([state, action], axis=1)
    h1f = jnp.maximum(x @ w1 + b1f, 0.0)
    h2f = jnp.maximum(h1f @ w2 + b2f, 0.0)
    q_ref_f32 = h2f @ w3 + b3f
    assert jnp.allclose(q, q_ref_f32, atol=5e-2, rtol=5e-2)

    print("KERNEL_OK")
</pallas_src>

<mosaic_0001>
module attributes {stable_mosaic.version = 11 : i64} {
  func.func @critic_kernel(%arg0: i32, %arg1: memref<8x16xf32, #tpu.memory_space<vmem>>, %arg2: memref<8x4xf32, #tpu.memory_space<vmem>>, %arg3: memref<16x256xbf16, #tpu.memory_space<vmem>>, %arg4: memref<4x256xbf16, #tpu.memory_space<vmem>>, %arg5: memref<1x256xf32, #tpu.memory_space<vmem>>, %arg6: memref<256x256xbf16, #tpu.memory_space<vmem>>, %arg7: memref<1x256xf32, #tpu.memory_space<vmem>>, %arg8: memref<1x256xf32, #tpu.memory_space<vmem>>, %arg9: memref<1x1xf32, #tpu.memory_space<vmem>>, %arg10: memref<8x1xf32, #tpu.memory_space<vmem>>) attributes {dimension_semantics = [#tpu.dimension_semantics<parallel>], iteration_bounds = array<i64: 1>, scalar_prefetch = 0 : i64, scratch_operands = 0 : i64, tpu.core_type = #tpu.core_type<tc>, window_params = [{transform_indices = @transform_0, window_bounds = array<i64: 8, 16>}, {transform_indices = @transform_1, window_bounds = array<i64: 8, 4>}, {pipeline_mode = #tpu.pipeline_mode<synchronous>, transform_indices = @transform_2, window_bounds = array<i64: 16, 256>}, {pipeline_mode = #tpu.pipeline_mode<synchronous>, transform_indices = @transform_3, window_bounds = array<i64: 4, 256>}, {pipeline_mode = #tpu.pipeline_mode<synchronous>, transform_indices = @transform_4, window_bounds = array<i64: 1, 256>}, {pipeline_mode = #tpu.pipeline_mode<synchronous>, transform_indices = @transform_5, window_bounds = array<i64: 256, 256>}, {pipeline_mode = #tpu.pipeline_mode<synchronous>, transform_indices = @transform_6, window_bounds = array<i64: 1, 256>}, {pipeline_mode = #tpu.pipeline_mode<synchronous>, transform_indices = @transform_7, window_bounds = array<i64: 1, 256>}, {pipeline_mode = #tpu.pipeline_mode<synchronous>, transform_indices = @transform_8, window_bounds = array<i64: 1, 1>}, {transform_indices = @transform_9, window_bounds = array<i64: 8, 1>}]} {
    %c0 = arith.constant 0 : index
    %c0_0 = arith.constant 0 : index
    %0 = vector.load %arg1[%c0, %c0_0] : memref<8x16xf32, #tpu.memory_space<vmem>>, vector<8x16xf32>
    %1 = arith.truncf %0 : vector<8x16xf32> to vector<8x16xbf16>
    %c0_1 = arith.constant 0 : index
    %c0_2 = arith.constant 0 : index
    %2 = vector.load %arg2[%c0_1, %c0_2] : memref<8x4xf32, #tpu.memory_space<vmem>>, vector<8x4xf32>
    %3 = arith.truncf %2 : vector<8x4xf32> to vector<8x4xbf16>
    %c0_3 = arith.constant 0 : index
    %c0_4 = arith.constant 0 : index
    %4 = vector.load %arg3[%c0_3, %c0_4] : memref<16x256xbf16, #tpu.memory_space<vmem>>, vector<16x256xbf16>
    %cst = arith.constant dense<0.000000e+00> : vector<8x256xf32>
    %5 = tpu.matmul %1, %4, %cst {dimension_numbers = #tpu.dot_dimension_numbers<[1], [0], [0], [1], [0, 0, 1, 1], [], []>} : vector<8x16xbf16>, vector<16x256xbf16>, vector<8x256xf32> -> vector<8x256xf32>
    %c0_5 = arith.constant 0 : index
    %c0_6 = arith.constant 0 : index
    %6 = vector.load %arg4[%c0_5, %c0_6] : memref<4x256xbf16, #tpu.memory_space<vmem>>, vector<4x256xbf16>
    %cst_7 = arith.constant dense<0.000000e+00> : vector<8x256xf32>
    %7 = tpu.matmul %3, %6, %cst_7 {dimension_numbers = #tpu.dot_dimension_numbers<[1], [0], [0], [1], [0, 0, 1, 1], [], []>} : vector<8x4xbf16>, vector<4x256xbf16>, vector<8x256xf32> -> vector<8x256xf32>
    %8 = arith.addf %5, %7 : vector<8x256xf32>
    %c0_8 = arith.constant 0 : index
    %c0_9 = arith.constant 0 : index
    %9 = vector.load %arg5[%c0_8, %c0_9] : memref<1x256xf32, #tpu.memory_space<vmem>>, vector<1x256xf32>
    %10 = vector.broadcast %9 : vector<1x256xf32> to vector<8x256xf32>
    %11 = arith.addf %8, %10 : vector<8x256xf32>
    %cst_10 = arith.constant 0.000000e+00 : f32
    %12 = vector.broadcast %cst_10 : f32 to vector<8x256xf32>
    %13 = arith.maximumf %11, %12 : vector<8x256xf32>
    %14 = arith.truncf %13 : vector<8x256xf32> to vector<8x256xbf16>
    %c0_11 = arith.constant 0 : index
    %c0_12 = arith.constant 0 : index
    %15 = vector.load %arg6[%c0_11, %c0_12] : memref<256x256xbf16, #tpu.memory_space<vmem>>, vector<256x256xbf16>
    %cst_13 = arith.constant dense<0.000000e+00> : vector<8x256xf32>
    %16 = tpu.matmul %14, %15, %cst_13 {dimension_numbers = #tpu.dot_dimension_numbers<[1], [0], [0], [1], [0, 0, 1, 1], [], []>} : vector<8x256xbf16>, vector<256x256xbf16>, vector<8x256xf32> -> vector<8x256xf32>
    %c0_14 = arith.constant 0 : index
    %c0_15 = arith.constant 0 : index
    %17 = vector.load %arg7[%c0_14, %c0_15] : memref<1x256xf32, #tpu.memory_space<vmem>>, vector<1x256xf32>
    %18 = vector.broadcast %17 : vector<1x256xf32> to vector<8x256xf32>
    %19 = arith.addf %16, %18 : vector<8x256xf32>
    %cst_16 = arith.constant 0.000000e+00 : f32
    %20 = vector.broadcast %cst_16 : f32 to vector<8x256xf32>
    %21 = arith.maximumf %19, %20 : vector<8x256xf32>
    %c0_17 = arith.constant 0 : index
    %c0_18 = arith.constant 0 : index
    %22 = vector.load %arg8[%c0_17, %c0_18] : memref<1x256xf32, #tpu.memory_space<vmem>>, vector<1x256xf32>
    %23 = vector.broadcast %22 : vector<1x256xf32> to vector<8x256xf32>
    %24 = arith.mulf %21, %23 : vector<8x256xf32>
    %cst_19 = arith.constant dense<0.000000e+00> : vector<8xf32>
    %25 = vector.multi_reduction <add>, %24, %cst_19 [1] : vector<8x256xf32> to vector<8xf32>
    %26 = vector.shape_cast %25 : vector<8xf32> to vector<8x1xf32>
    %c0_20 = arith.constant 0 : index
    %c0_21 = arith.constant 0 : index
    %27 = vector.load %arg9[%c0_20, %c0_21] : memref<1x1xf32, #tpu.memory_space<vmem>>, vector<1x1xf32>
    %28 = vector.broadcast %27 : vector<1x1xf32> to vector<8x1xf32>
    %29 = arith.addf %26, %28 : vector<8x1xf32>
    %c0_22 = arith.constant 0 : index
    %c0_23 = arith.constant 0 : index
    %30 = vector.load %arg10[%c0_22, %c0_23] : memref<8x1xf32, #tpu.memory_space<vmem>>, vector<8x1xf32>
    tpu.vector_store %arg10[%c0_22, %c0_23], %29 {strides = array<i32>} : memref<8x1xf32, #tpu.memory_space<vmem>>, vector<8x1xf32>,
    return
  }
  func.func @transform_0(%arg0: i32) -> (i32, i32) {
    %c0_i32 = arith.constant 0 : i32
    %c0_i32_0 = arith.constant 0 : i32
    return %arg0, %c0_i32 : i32, i32
  }
  func.func @transform_1(%arg0: i32) -> (i32, i32) {
    %c0_i32 = arith.constant 0 : i32
    %c0_i32_0 = arith.constant 0 : i32
    return %arg0, %c0_i32 : i32, i32
  }
  func.func @transform_2(%arg0: i32) -> (i32, i32) {
    %c0_i32 = arith.constant 0 : i32
    %c0_i32_0 = arith.constant 0 : i32
    %c0_i32_1 = arith.constant 0 : i32
    return %c0_i32, %c0_i32_0 : i32, i32
  }
  func.func @transform_3(%arg0: i32) -> (i32, i32) {
    %c0_i32 = arith.constant 0 : i32
    %c0_i32_0 = arith.constant 0 : i32
    %c0_i32_1 = arith.constant 0 : i32
    return %c0_i32, %c0_i32_0 : i32, i32
  }
  func.func @transform_4(%arg0: i32) -> (i32, i32) {
    %c0_i32 = arith.constant 0 : i32
    %c0_i32_0 = arith.constant 0 : i32
    %c0_i32_1 = arith.constant 0 : i32
    return %c0_i32, %c0_i32_0 : i32, i32
  }
  func.func @transform_5(%arg0: i32) -> (i32, i32) {
    %c0_i32 = arith.constant 0 : i32
    %c0_i32_0 = arith.constant 0 : i32
    %c0_i32_1 = arith.constant 0 : i32
    return %c0_i32, %c0_i32_0 : i32, i32
  }
  func.func @transform_6(%arg0: i32) -> (i32, i32) {
    %c0_i32 = arith.constant 0 : i32
    %c0_i32_0 = arith.constant 0 : i32
    %c0_i32_1 = arith.constant 0 : i32
    return %c0_i32, %c0_i32_0 : i32, i32
  }
  func.func @transform_7(%arg0: i32) -> (i32, i32) {
    %c0_i32 = arith.constant 0 : i32
    %c0_i32_0 = arith.constant 0 : i32
    %c0_i32_1 = arith.constant 0 : i32
    return %c0_i32, %c0_i32_0 : i32, i32
  }
  func.func @transform_8(%arg0: i32) -> (i32, i32) {
    %c0_i32 = arith.constant 0 : i32
    %c0_i32_0 = arith.constant 0 : i32
    %c0_i32_1 = arith.constant 0 : i32
    return %c0_i32, %c0_i32_0 : i32, i32
  }
  func.func @transform_9(%arg0: i32) -> (i32, i32) {
    %c0_i32 = arith.constant 0 : i32
    %c0_i32_0 = arith.constant 0 : i32
    return %arg0, %c0_i32 : i32, i32
  }
}

</mosaic_0001>

<bundles_post_ra>
// kernel: critic_forward.1
= control target key start
LH: loop header
LB: loop body
LE: loop exit
PB: predicated region body
PF: predicated region fallthrough
CT: control target
= control target key end

     0   :  { %s738_s0 = inlined_call_operand.hbm [shape: f32[8,16], index: 0, kind: input, shape index: {}]   ;;  %s739_s1 = inlined_call_operand.vmem [shape: f32[8,4], index: 1, kind: input, shape index: {}]   ;;  %s740_s2 = inlined_call_operand.vmem [shape: bf16[16,256], index: 2, kind: input, shape index: {}]   ;;  %s741_s3 = inlined_call_operand.vmem [shape: bf16[4,256], index: 3, kind: input, shape index: {}]   ;;  %s742_s4 = inlined_call_operand.vmem [shape: f32[1,256], index: 4, kind: input, shape index: {}]   ;;  %s743_s5 = inlined_call_operand.hbm [shape: bf16[256,256], index: 5, kind: input, shape index: {}]   ;;  %s744_s6 = inlined_call_operand.vmem [shape: f32[1,256], index: 6, kind: input, shape index: {}]   ;;  %s745_s7 = inlined_call_operand.vmem [shape: f32[1,256], index: 7, kind: input, shape index: {}]   ;;  %s746_s8 = inlined_call_operand.<no memory space> [shape: f32[1,1], index: 8, kind: input, shape index: {}]   ;;  %s747_s9 = inlined_call_operand.vmem [shape: f32[8,1], index: 9, kind: output, shape index: {}]  }
   0x1   :  { %v14_v0 = vstv %s746_s8 }
   0x2   :  { %15 = vst [vmem:[#allocation2] sm:$0x1] %v14_v0 }
   0x3   :  { %16 = vsyncpa [#allocation4], 0 }
   0x4   :  { %17 = vsyncpa [#allocation6], 0  ;;  %s625_s11 = smov [#allocation3]   ;;  %s626_s13 = smov [#allocation5]  }
   0x5   :  { %s24_s12 = sshll.u32 %s625_s11, 4  ;;  %s41_s14 = sshll.u32 %s626_s13, 4  ;;  %s25_s12 = int_to_ptr.vmem [resolvable:$true] %s24_s12  ;;  %s683_s14 = int_to_ptr.vmem [resolvable:$true] %s41_s14 }
   0x6   :  { %s577_s17 = scalar_lea.hbm %s738_s0, 128 }
   0x7   :  { %p578_p0 = scmp.ne.s32.totalorder %s738_s0, %s577_s17  ;;  %p581_p1 = scmp.lt.u32.totalorder %s577_s17, %s738_s0 }
   0x9   :  { %p583_p2 = pnand %p581_p1, %p578_p0 }
   0xb   :  { %586 = shalt.err (!%p583_p2)
}
   0xc   :  { %s587_s21 = scalar_lea.vmem %s25_s12, 128  ;;  %p592_p4 = scmp.lt.s32.totalorder %s25_s12, %s25_s12 }
   0xd   :  { %p588_p3 = scmp.ne.s32.totalorder %s25_s12, %s587_s21  ;;  %p593_p5 = scmp.lt.s32.totalorder %s587_s21, %s587_s21 }
   0xf   :  { %p594_p6 = por %p593_p5, %p592_p4 }
  0x11   :  { %p595_p7 = pnand %p594_p6, %p588_p3 }
  0x13   :  { %598 = shalt.err (!%p595_p7)
}
  0x14   :  { %27 = dma.hbm_to_vmem [thread:$0]  %s738_s0, 128, %s25_s12, [#allocation4]  }
  0x15   :  { %s599_s26 = scalar_lea.hbm %s743_s5, 4096 }
  0x16   :  { %p600_p8 = scmp.ne.s32.totalorder %s743_s5, %s599_s26  ;;  %p603_p9 = scmp.lt.u32.totalorder %s599_s26, %s743_s5 }
  0x18   :  { %p605_p10 = pnand %p603_p9, %p600_p8 }
  0x1a   :  { %608 = shalt.err (!%p605_p10)
}
  0x1b   :  { %s609_s10 = scalar_lea.vmem %s683_s14, 4096  ;;  %p614_p12 = scmp.lt.s32.totalorder %s683_s14, %s683_s14 }
  0x1c   :  { %p610_p11 = scmp.ne.s32.totalorder %s683_s14, %s609_s10  ;;  %p615_p13 = scmp.lt.s32.totalorder %s609_s10, %s609_s10 }
  0x1e   :  { %p616_p0 = por %p615_p13, %p614_p12 }
  0x20   :  { %p617_p1 = pnand %p616_p0, %p610_p11 }
  0x22   :  { %620 = shalt.err (!%p617_p1)
}
  0x23   :  { %s627_s0 = smov 128   ;;  %s628_s11 = smov 8  }
  0x24   :  { %47 = dma.hbm_to_vmem [thread:$0]  %s743_s5, 4096, %s683_s14, [#allocation6], %s627_s0, %s627_s0, %s628_s11  }
  0x25   :  { %621 = dma.done.wait [#allocation4], 128  }
  0x26   :  { %622 = vsyncadd [#allocation4], 4294967168 }
  0x27   :  { %623 = dma.done.wait [#allocation6], 4096  }
  0x28   :  { %624 = vsyncadd [#allocation6], 4294963200  ;;  %v629_v1 = vmov 0   ;;  %vm81_vm0 = vcmask 1041408   ;;  %v63_v3 = vld [vmem:[%s739_s1] sm:$0xff]  ;;  %vm77_vm1 = vcmask 31744   ;;  %v186_v43 = vlaneseq }
  0x29   :  { %120 = vmatprep.mubr.bf16.mxu1 %v629_v1  ;;  %v482_v2 = vld.sshfl [vmem:[%s741_s3] sm:$0x33 pattern:$0x76325410]  ;;  %v528_v6 = vld [vmem:[%s740_s2 + $0x4] ss:$8 sps:$4 sm:$0xff]   ;;  %v64_v7 = vpack.c.bf16 %v63_v3, %v63_v3 }
  0x2a   :  { %v76_v4 = vcombine.high %v482_v2, %v482_v2  ;;  %v83_v5 = vsel %vm81_vm0, %v482_v2, 0  ;;  %v529_v8 = vld [vmem:[#allocation5 + $0x4] ss:$8 sps:$4 sm:$0xff]   ;;  %v531_v9 = vld [vmem:[#allocation5] ss:$8 sps:$4 sm:$0xff]   ;;  %v61_v14 = vld [vmem:[#allocation3] sm:$0xff] }
  0x2b   :  { %v526_v10 = vld [vmem:[%s740_s2] ss:$8 sps:$4 sm:$0xff]   ;;  %406 = vmatprep.subr.bf16.mxu0 %v529_v8  ;;  %v535_v13 = vld [vmem:[#allocation5 + $0x24] ss:$8 sps:$4 sm:$0xff]   ;;  %v62_v16 = vpack.c.bf16 %v61_v14, %v61_v14  ;;  %vm139_vm2 = vcmask 130048   ;;  %v187_v44 = vshrl.u32 %v186_v43, 7 }
  0x2c   :  { %483 = vmatprep.subr.msk.bf16.mxu1 %vm81_vm0, %v76_v4  ;;  %v532_v11 = vld [vmem:[#allocation5 + $0x14] ss:$8 sps:$4 sm:$0xff]   ;;  %407 = vmatpush1.bf16.msra.mxu0 %v531_v9  ;;  %v534_v12 = vld [vmem:[#allocation5 + $0x10] ss:$8 sps:$4 sm:$0xff]   ;;  %v537_v15 = vld [vmem:[#allocation5 + $0x20] ss:$8 sps:$4 sm:$0xff]  }
  0x2d   :  { %89 = vmatpush1.bf16.msra.mxu1 %v83_v5  ;;  %408 = vmatprep.subr.bf16.mxu0 %v532_v11  ;;  %v538_v17 = vld [vmem:[#allocation5 + $0x34] ss:$8 sps:$4 sm:$0xff]   ;;  %v540_v18 = vld [vmem:[#allocation5 + $0x30] ss:$8 sps:$4 sm:$0xff]   ;;  %v541_v19 = vld [vmem:[#allocation5 + $0x44] ss:$8 sps:$4 sm:$0xff]  }
  0x2e   :  { %143 = vmatprep.subr.bf16.mxu1 %v528_v6  ;;  %v543_v20 = vld [vmem:[#allocation5 + $0x40] ss:$8 sps:$4 sm:$0xff]   ;;  %v544_v21 = vld [vmem:[#allocation5 + $0x54] ss:$8 sps:$4 sm:$0xff]   ;;  %v546_v22 = vld [vmem:[#allocation5 + $0x50] ss:$8 sps:$4 sm:$0xff]  }
  0x2f   :  { %v547_v23 = vld [vmem:[#allocation5 + $0x64] ss:$8 sps:$4 sm:$0xff]   ;;  %v549_v24 = vld [vmem:[#allocation5 + $0x60] ss:$8 sps:$4 sm:$0xff]   ;;  %v550_v25 = vld [vmem:[#allocation5 + $0x74] ss:$8 sps:$4 sm:$0xff]  }
  0x30   :  { %484 = vmatmul.mubr.msk.bf16.vlgmr.msra.gmra.mrb[0].mxu1 %vm77_vm1, %v64_v7  ;;  %409 = vmatpush1.bf16.msra.mxu0 %v534_v12  ;;  %v552_v26 = vld [vmem:[#allocation5 + $0x70] ss:$8 sps:$4 sm:$0xff]   ;;  %v553_v27 = vld [vmem:[#allocation5 + $0x84] ss:$8 sps:$4 sm:$0xff]   ;;  %v555_v28 = vld [vmem:[#allocation5 + $0x80] ss:$8 sps:$4 sm:$0xff]  }
  0x31   :  { %144 = vmatpush1.bf16.msra.mxu1 %v526_v10  ;;  %175 = vmatprep.mubr.bf16.mxu1 %v629_v1  ;;  %v556_v29 = vld [vmem:[#allocation5 + $0x94] ss:$8 sps:$4 sm:$0xff]   ;;  %v558_v30 = vld [vmem:[#allocation5 + $0x90] ss:$8 sps:$4 sm:$0xff]   ;;  %v559_v31 = vld [vmem:[#allocation5 + $0xa4] ss:$8 sps:$4 sm:$0xff]  }
  0x32   :  { %410 = vmatprep.subr.bf16.mxu0 %v535_v13  ;;  %v561_v32 = vld [vmem:[#allocation5 + $0xa0] ss:$8 sps:$4 sm:$0xff]   ;;  %v562_v33 = vld [vmem:[#allocation5 + $0xb4] ss:$8 sps:$4 sm:$0xff]   ;;  %v564_v34 = vld [vmem:[#allocation5 + $0xb0] ss:$8 sps:$4 sm:$0xff]  }
  0x33   :  { %v565_v35 = vld [vmem:[#allocation5 + $0xc4] ss:$8 sps:$4 sm:$0xff]   ;;  %v567_v36 = vld [vmem:[#allocation5 + $0xc0] ss:$8 sps:$4 sm:$0xff]   ;;  %v568_v37 = vld [vmem:[#allocation5 + $0xd4] ss:$8 sps:$4 sm:$0xff]  }
  0x34   :  { %411 = vmatpush1.bf16.msra.mxu0 %v537_v15  ;;  %v570_v38 = vld [vmem:[#allocation5 + $0xd0] ss:$8 sps:$4 sm:$0xff]   ;;  %v571_v39 = vld [vmem:[#allocation5 + $0xe4] ss:$8 sps:$4 sm:$0xff]   ;;  %v573_v40 = vld [vmem:[#allocation5 + $0xe0] ss:$8 sps:$4 sm:$0xff]  }
  0x35   :  { %412 = vmatprep.subr.bf16.mxu0 %v538_v17  ;;  %v574_v41 = vld [vmem:[#allocation5 + $0xf4] ss:$8 sps:$4 sm:$0xff]   ;;  %v576_v42 = vld [vmem:[#allocation5 + $0xf0] ss:$8 sps:$4 sm:$0xff]   ;;  %v188_v49 = vsub.s32 0, %v187_v44  ;;  %v192_v51 = vsub.s32 1, %v187_v44 }
  0x36   :  { %v184_v50 = vld [vmem:[%s742_s4] sm:$0x3]  ;;  %vm474_vm3 = vcmask 7168  }
  0x37   :  { %v189_v52 = vrot.slane %v184_v50, %v188_v49  ;;  %v193_v54 = vrot.slane %v184_v50, %v192_v51  ;;  %v234_v2 = vld [vmem:[%s744_s6] sm:$0x3] }
  0x38   :  { %487 = vmatmul.mubr.msk.bf16.vlgmr.msra.gmra.mrb[4].mxu1 %vm139_vm2, %v62_v16  ;;  %413 = vmatpush1.bf16.msra.mxu0 %v540_v18  ;;  %v239_v3 = vrot.slane %v234_v2, %v188_v49  ;;  %v243_v4 = vrot.slane %v234_v2, %v192_v51  ;;  %v449_v5 = vld [vmem:[%s745_s7] sm:$0x3] }
  0x39   :  { %414 = vmatprep.subr.bf16.mxu0 %v541_v19  ;;  %v454_v9 = vrot.slane %v449_v5, %v188_v49  ;;  %v458_v12 = vrot.slane %v449_v5, %v192_v51  ;;  %v520_v19 = vld [vmem:[#allocation2] ss:$0 sm:$0xff] }
  0x3c   :  { %415 = vmatpush1.bf16.msra.mxu0 %v543_v20 }
  0x3d   :  { %416 = vmatprep.subr.bf16.mxu0 %v544_v21 }
  0x40   :  { %417 = vmatpush1.bf16.msra.mxu0 %v546_v22 }
  0x41   :  { %418 = vmatprep.subr.bf16.mxu0 %v547_v23 }
  0x44   :  { %419 = vmatpush1.bf16.msra.mxu0 %v549_v24 }
  0x45   :  { %420 = vmatprep.subr.bf16.mxu0 %v550_v25 }
  0x48   :  { %421 = vmatpush1.bf16.msra.mxu0 %v552_v26 }
  0x49   :  { %422 = vmatprep.subr.bf16.mxu0 %v553_v27 }
  0x4c   :  { %423 = vmatpush1.bf16.msra.mxu0 %v555_v28 }
  0x4d   :  { %424 = vmatprep.subr.bf16.mxu0 %v556_v29 }
  0x50   :  { %425 = vmatpush1.bf16.msra.mxu0 %v558_v30 }
  0x51   :  { %426 = vmatprep.subr.bf16.mxu0 %v559_v31 }
  0x54   :  { %427 = vmatpush1.bf16.msra.mxu0 %v561_v32 }
  0x55   :  { %428 = vmatprep.subr.bf16.mxu0 %v562_v33 }
  0x58   :  { %429 = vmatpush1.bf16.msra.mxu0 %v564_v34 }
  0x59   :  { %430 = vmatprep.subr.bf16.mxu0 %v565_v35 }
  0x5c   :  { %431 = vmatpush1.bf16.msra.mxu0 %v567_v36 }
  0x5d   :  { %432 = vmatprep.subr.bf16.mxu0 %v568_v37 }
  0x60   :  { %433 = vmatpush1.bf16.msra.mxu0 %v570_v38 }
  0x61   :  { %434 = vmatprep.subr.bf16.mxu0 %v571_v39 }
  0x64   :  { %435 = vmatpush1.bf16.msra.mxu0 %v573_v40 }
  0x65   :  { %436 = vmatprep.subr.bf16.mxu0 %v574_v41 }
  0x68   :  { %437 = vmatpush1.bf16.msra.mxu0 %v576_v42 }
 0x103   :  { %v122_v45 = vpop.f32.mrb[0].mxu1 }
 0x104   :  { %v124_v46 = vpop.f32.mrb[1].mxu1 }
 0x105   :  { %v126_v47 = vpop.f32.mrb[2].mxu1 }
 0x106   :  { %v127_v48 = vpop.f32.mrb[3].mxu1 }
 0x10b   :  { %v177_v53 = vpop.f32.mrb[4].mxu1 }
 0x10c   :  { %v178_v55 = vadd.f32 %v177_v53, %v122_v45  ;;  %v179_v56 = vpop.f32.mrb[5].mxu1 }
 0x10d   :  { %v180_v57 = vadd.f32 %v179_v56, %v124_v46  ;;  %v181_v58 = vpop.f32.mrb[6].mxu1 }
 0x10e   :  { %v196_v59 = vadd.f32 %v189_v52, %v178_v55  ;;  %v182_v60 = vpop.f32.mrb[7].mxu1 }
 0x10f   :  { %v197_v61 = vadd.f32 %v193_v54, %v180_v57 }
 0x110   :  { %v198_v62 = vmax.f32 %v196_v59, 0.0 }
 0x111   :  { %v199_v63 = vmax.f32 %v197_v61, 0.0 }
 0x112   :  { %v200_v1 = vpack.c.bf16 %v198_v62, %v198_v62 }
 0x113   :  { %v201_v0 = vpack.c.bf16 %v199_v63, %v199_v63 }
 0x115   :  { %438 = vmatprep.mubr.bf16.mxu0 %v201_v0 }
 0x116   :  { %439 = vmatmul.mubr.bf16.vlgmr.msra.gmra.mrb[0].mxu0 %v200_v1 }
 0x1e9   :  { %v440_v6 = vpop.f32.mrb[0].mxu0 }
 0x1ea   :  { %v441_v7 = vadd.f32 %v440_v6, %v239_v3  ;;  %v442_v8 = vpop.f32.mrb[1].mxu0 }
 0x1eb   :  { %v443_v10 = vadd.f32 %v442_v8, %v243_v4  ;;  %v444_v11 = vpop.f32.mrb[2].mxu0 }
 0x1ec   :  { %v447_v13 = vmax.f32 %v441_v7, 0.0  ;;  %v445_v14 = vpop.f32.mrb[3].mxu0 }
 0x1ed   :  { %v448_v15 = vmax.f32 %v443_v10, 0.0 }
 0x1ee   :  { %v461_v16 = vmul.f32 %v454_v9, %v447_v13 }
 0x1ef   :  { %v462_v17 = vmul.f32 %v458_v12, %v448_v15 }
 0x1f1   :  { %v463_v18 = vadd.f32 %v462_v17, %v461_v16 }
 0x1f3   :  { %464 = vadd.xlane.f32.xlu0 %v463_v18 }
 0x280   :  { %v465_v20 = vpop.xlane.xlu0 %464 }
 0x281   :  { %v473_v21 = vadd.f32 %v520_v19, %v465_v20 }
 0x283   :  { %475 = vst.msk [vmem:[%s747_s9] sm:$0xff] %vm474_vm3, %v473_v21 }
 0x284   :  { %480 = vsyncpa [#allocation4], 1 }
 0x285   :  { %481 = vsyncpa [#allocation6], 1 }

</bundles_post_ra>
